<compile_context>
chip_gen: v7x
topology: tpu7x:2x2x1
jax: 0.10.0
libtpu: 0.0.40
codegen_flags: <defaults>
</compile_context>

<pallas_src>
import math
from functools import partial

import jax
import jax.numpy as jnp
from jax.experimental import pallas as pl
from jax.experimental.pallas import tpu as pltpu


_ROW_CHUNK = 512  # inner strip: bounds live vregs inside a large VMEM tile


def _round_up(x: int, m: int) -> int:
    return ((x + m - 1) // m) * m


def _choose_tile_b(b: int, dim: int) -> tuple:
    """Pick (tile_b, row_chunk): batch rows per grid step and per inner strip."""
    b8 = _round_up(b, 8)
    if b8 <= _ROW_CHUNK:
        return b8, b8  # tiny batch: one tile, one strip
    # Rows per grid tile from a ~6 MiB f32 output-tile budget; double-buffered
    # in+out stays well inside every generation's scoped-VMEM limit.
    budget_rows = max(_ROW_CHUNK, ((6 << 20) // (4 * dim)) // _ROW_CHUNK * _ROW_CHUNK)
    tile_b = min(_round_up(b8, _ROW_CHUNK), budget_rows)
    # Keep >= 2 grid steps so v7x's two TensorCores can both be used; on 1-TC
    # chips (v5e/v6e) the extra step only costs ~0.35 us.
    if pl.cdiv(b, tile_b) < 2:
        tile_b = max(_ROW_CHUNK, _round_up(pl.cdiv(b, 2), _ROW_CHUNK))
    return tile_b, _ROW_CHUNK


def _sin_cos_kernel(t_ref, f_ref, out_ref, *, chunk: int, dense: bool):
    # t_ref:   (tile_b, 1)  f32 VMEM   — timestep column
    # f_ref:   (1, W)       f32 VMEM   — W = dim (duplicated freqs) if dense else dim//2
    # out_ref: (tile_b, dim) f32 VMEM
    dim = out_ref.shape[1]
    half = dim // 2
    n_chunks = out_ref.shape[0] // chunk

    freqs = f_ref[...]  # loaded once per grid step (constant block)
    if dense:
        lane = jax.lax.broadcasted_iota(jnp.int32, (1, dim), 1)
        is_sin = lane < half  # first half of the lanes -> sin, second half -> cos

    def emit(r0):
        rows = pl.ds(r0, chunk)
        # Broadcast outer product on the VPU (deliberately NOT an MXU dot).
        ang = t_ref[rows, :] * freqs  # (chunk, W)
        if dense:
            # Single full-width, lane-dense store; extra sin/cos hides on the EUP.
            out_ref[rows, :] = jnp.where(is_sin, jnp.sin(ang), jnp.cos(ang))
        else:
            # half_dim % 128 == 0: both half-slice stores are already unmasked.
            out_ref[rows, :half] = jnp.sin(ang)
            out_ref[rows, half:] = jnp.cos(ang)

    if n_chunks == 1:
        emit(0)
    else:
        def body(c, carry):
            emit(pl.multiple_of(c * chunk, chunk))
            return carry
        jax.lax.fori_loop(0, n_chunks, body, 0)


def sinusoidal_time_embeddings(time: jax.Array, dim: int) -> jax.Array:
    """Pallas TPU equivalent of SinusoidalTimeEmbeddings(dim)(time).

    time: (B,) tensor of diffusion timesteps.
    Returns: (B, dim) float32 embeddings [sin | cos].
    """
    assert time.ndim == 1, "time must be a 1-D tensor (B,)"
    assert dim % 2 == 0 and dim >= 4, "dim must be an even integer >= 4"
    b = time.shape[0]
    half = dim // 2

    # Lane-dense single store unless half_dim is already a multiple of 128.
    dense = (half % 128) != 0

    # Frequency table hoisted out of the kernel (computed once, tiny).
    scale = -(math.log(10000.0) / (half - 1))
    base = jnp.exp(jnp.arange(half, dtype=jnp.float32) * scale)
    if dense:
        freqs = jnp.concatenate([base, base]).reshape(1, dim)  # duplicated: [f | f]
        fw = dim
    else:
        freqs = base.reshape(1, half)
        fw = half

    tile_b, chunk = _choose_tile_b(b, dim)
    grid = (pl.cdiv(b, tile_b),)

    t2d = time.astype(jnp.float32).reshape(b, 1)

    kernel = partial(_sin_cos_kernel, chunk=chunk, dense=dense)

    out = pl.pallas_call(
        kernel,
        out_shape=jax.ShapeDtypeStruct((b, dim), jnp.float32),
        grid_spec=pltpu.PrefetchScalarGridSpec(
            num_scalar_prefetch=0,
            grid=grid,
            in_specs=[
                pl.BlockSpec((tile_b, 1), lambda i: (i, 0)),   # timestep column tile
                pl.BlockSpec((1, fw), lambda i: (0, 0)),       # freqs, constant block
            ],
            out_specs=pl.BlockSpec((tile_b, dim), lambda i: (i, 0)),
        ),
        compiler_params=pltpu.CompilerParams(
            dimension_semantics=("parallel",),
            vmem_limit_bytes=32 << 20,  # headroom for multi-MiB tiles on every gen
        ),
    )(t2d, freqs)

    return out


def _reference(time: jax.Array, dim: int) -> jax.Array:
    # Pure-JAX reference mirroring the PyTorch forward.
    half_dim = dim // 2
    emb = math.log(10000.0) / (half_dim - 1)
    emb = jnp.exp(jnp.arange(half_dim, dtype=jnp.float32) * -emb)
    emb = time.astype(jnp.float32)[:, None] * emb[None, :]
    return jnp.concatenate([jnp.sin(emb), jnp.cos(emb)], axis=-1)


if __name__ == "__main__":
    key = jax.random.PRNGKey(0)
    B, DIM = 8, 32  # small shapes consistent with the module (batch of timesteps, dim=32)

    # Deterministic example "time" input (diffusion timesteps, float).
    time = jax.random.uniform(key, (B,), dtype=jnp.float32) * 1000.0

    out = jax.block_until_ready(sinusoidal_time_embeddings(time, DIM))
    ref = _reference(time, DIM)
    assert out.shape == (B, DIM)
    assert out.dtype == jnp.float32
    # Loose-ish atol: sin/cos argument reduction of ~1e3-rad angles can differ
    # by a few 1e-5 between Mosaic and XLA; structural bugs are O(1) errors.
    assert jnp.allclose(out, ref, atol=5e-4, rtol=1e-4), "mismatch vs reference"

    # Larger, non-tile-aligned batch: exercises the multi-step "parallel" grid,
    # the ragged last block (no wrapper pad / slice), and the in-kernel strips.
    B2 = 1000
    time2 = jax.random.uniform(jax.random.PRNGKey(1), (B2,), dtype=jnp.float32) * 1000.0
    out2 = jax.block_until_ready(sinusoidal_time_embeddings(time2, DIM))
    ref2 = _reference(time2, DIM)
    assert out2.shape == (B2, DIM)
    assert jnp.allclose(out2, ref2, atol=5e-4, rtol=1e-4), "mismatch vs reference (large batch)"

    print("KERNEL_OK")
</pallas_src>

<mosaic_0001>
module attributes {stable_mosaic.version = 11 : i64} {
  func.func @_sin_cos_kernel(%arg0: i32, %arg1: memref<8x1xf32, #tpu.memory_space<vmem>>, %arg2: memref<1x32xf32, #tpu.memory_space<vmem>>, %arg3: memref<8x32xf32, #tpu.memory_space<vmem>>) attributes {dimension_semantics = [#tpu.dimension_semantics<parallel>], iteration_bounds = array<i64: 1>, scalar_prefetch = 0 : i64, scratch_operands = 0 : i64, tpu.core_type = #tpu.core_type<tc>, window_params = [{transform_indices = @transform_0, window_bounds = array<i64: 8, 1>}, {pipeline_mode = #tpu.pipeline_mode<synchronous>, transform_indices = @transform_1, window_bounds = array<i64: 1, 32>}, {transform_indices = @transform_2, window_bounds = array<i64: 8, 32>}]} {
    %c0 = arith.constant 0 : index
    %c0_0 = arith.constant 0 : index
    %0 = vector.load %arg2[%c0, %c0_0] : memref<1x32xf32, #tpu.memory_space<vmem>>, vector<1x32xf32>
    %1 = tpu.iota {dimensions = array<i32: 1>} : vector<1x32xi32>
    %c16_i32 = arith.constant 16 : i32
    %2 = vector.broadcast %c16_i32 : i32 to vector<1x32xi32>
    %3 = arith.cmpi slt, %1, %2 : vector<1x32xi32>
    %c0_1 = arith.constant 0 : index
    %c0_2 = arith.constant 0 : index
    %4 = vector.load %arg1[%c0_1, %c0_2] : memref<8x1xf32, #tpu.memory_space<vmem>>, vector<8x1xf32>
    %5 = vector.broadcast %4 : vector<8x1xf32> to vector<8x32xf32>
    %6 = vector.broadcast %0 : vector<1x32xf32> to vector<8x32xf32>
    %7 = arith.mulf %5, %6 : vector<8x32xf32>
    %8 = math.sin %7 : vector<8x32xf32>
    %9 = math.cos %7 : vector<8x32xf32>
    %10 = vector.shape_cast %3 : vector<1x32xi1> to vector<1x32xi1>
    %11 = vector.broadcast %10 : vector<1x32xi1> to vector<8x32xi1>
    %12 = arith.select %11, %8, %9 : vector<8x32xi1>, vector<8x32xf32>
    %c0_3 = arith.constant 0 : index
    %c0_4 = arith.constant 0 : index
    %13 = vector.load %arg3[%c0_3, %c0_4] : memref<8x32xf32, #tpu.memory_space<vmem>>, vector<8x32xf32>
    tpu.vector_store %arg3[%c0_3, %c0_4], %12 {strides = array<i32>} : memref<8x32xf32, #tpu.memory_space<vmem>>, vector<8x32xf32>,
    return
  }
  func.func @transform_0(%arg0: i32) -> (i32, i32) {
    %c0_i32 = arith.constant 0 : i32
    %c0_i32_0 = arith.constant 0 : i32
    return %arg0, %c0_i32 : i32, i32
  }
  func.func @transform_1(%arg0: i32) -> (i32, i32) {
    %c0_i32 = arith.constant 0 : i32
    %c0_i32_0 = arith.constant 0 : i32
    %c0_i32_1 = arith.constant 0 : i32
    return %c0_i32, %c0_i32_0 : i32, i32
  }
  func.func @transform_2(%arg0: i32) -> (i32, i32) {
    %c0_i32 = arith.constant 0 : i32
    %c0_i32_0 = arith.constant 0 : i32
    return %arg0, %c0_i32 : i32, i32
  }
}

</mosaic_0001>

<bundles_post_ra>
// kernel: tpu_custom_call.1
= control target key start
LH: loop header
LB: loop body
LE: loop exit
PB: predicated region body
PF: predicated region fallthrough
CT: control target
= control target key end

     0   :  { %v305_v1 = vmov 0   ;;  %s368_s0 = inlined_call_operand.vmem [shape: f32[8,1], index: 0, kind: input, shape index: {}]   ;;  %s369_s1 = inlined_call_operand.vmem [shape: f32[1,32], index: 1, kind: input, shape index: {}]   ;;  %s370_s2 = inlined_call_operand.hbm [shape: f32[8,32], index: 2, kind: output, shape index: {}]  }
   0x1   :  { %v16_v0 = vld [vmem:[%s368_s0] sm:$0xff]  ;;  %276 = vset.pattern.permute.xlu0 %v305_v1 }
   0x2   :  { %19 = vperm.xlu0 %276, %v16_v0  }
   0x3   :  { %7 = vsyncpa [#allocation3], 0  ;;  %v255_v2 = vld [vmem:[%s369_s1] ss:$0 sm:$0xff]  ;;  %v306_v15 = vmov 683565275  }
   0x4   :  { %v307_v17 = vmov 2475754826   ;;  %v308_v20 = vmov 2131351028   ;;  %v309_v23 = vmov 2102212464  }
   0x5   :  { %v310_v26 = vmov 920167782   ;;  %v311_v29 = vmov 1326507024   ;;  %s312_s0 = smov [#allocation2]  }
   0x6   :  { %s247_s1 = sshll.u32 %s312_s0, 4  ;;  %s248_s1 = int_to_ptr.vmem [resolvable:$true] %s247_s1 }
   0x7   :  { %s281_s13 = scalar_lea.vmem %s248_s1, 128  ;;  %p286_p1 = scmp.lt.s32.totalorder %s248_s1, %s248_s1 }
   0x8   :  { %p282_p0 = scmp.ne.s32.totalorder %s248_s1, %s281_s13  ;;  %p287_p2 = scmp.lt.s32.totalorder %s281_s13, %s281_s13 }
   0xa   :  { %p288_p3 = por %p287_p2, %p286_p1 }
   0xc   :  { %p289_p4 = pnand %p288_p3, %p282_p0 }
  0x81   :  { %v20_v3 = vpop.permute.xlu0 %19 }
  0x82   :  { %v334_v4 = vmul.f32 %v255_v2, %v20_v3 }
  0x84   :  { %v32_v5 = vand.u32 2139095040, %v334_v4  ;;  %v29_v9 = vand.u32 2147483647, %v334_v4  ;;  %vm31_vm7 = vcmp.lt.s32.totalorder %v334_v4, 0 }
  0x86   :  { %v33_v6 = vshrl.u32 %v32_v5, 23  ;;  %v36_v12 = vand.u32 8388607, %v29_v9  ;;  %vm30_vm8 = vcmp.le.f32.partialorder %v29_v9, 0.7853982 }
  0x88   :  { %v256_v7 = vadd.s32 4294967169, %v33_v6  ;;  %v37_v31 = vor.u32 8388608, %v36_v12 }
  0x8a   :  { %v39_v8 = vadd.s32 1, %v256_v7  ;;  %v77_v45 = vshll.u32 %v37_v31, 8 }
  0x8c   :  { %vm40_vm0 = vcmp.gt.s32.totalorder %v39_v8, 0 }
  0x8d   :  { %v41_v10 = vsel %vm40_vm0, %v39_v8, 0  ;;  %vm121_vm0 = vweird.f32 %v334_v4 }
  0x8e   :  { %v43_v11 = vand.u32 31, %v41_v10  ;;  %v42_v14 = vshrl.u32 %v41_v10, 5 }
  0x90   :  { %v44_v13 = vsub.s32 32, %v43_v11  ;;  %v46_v16 = vshll.u32 %v306_v15, %v43_v11  ;;  %v49_v18 = vshll.u32 %v307_v17, %v43_v11  ;;  %v52_v22 = vshll.u32 %v308_v20, %v43_v11 }
  0x91   :  { %v55_v25 = vshll.u32 %v309_v23, %v43_v11  ;;  %v58_v28 = vshll.u32 %v310_v26, %v43_v11  ;;  %vm61_vm1 = vcmp.lt.s32.totalorder %v42_v14, 1  ;;  %vm64_vm2 = vcmp.lt.s32.totalorder %v42_v14, 4 }
  0x92   :  { %v47_v19 = vshrl.u32 %v307_v17, %v44_v13  ;;  %v50_v21 = vshrl.u32 %v308_v20, %v44_v13  ;;  %v53_v24 = vshrl.u32 %v309_v23, %v44_v13  ;;  %v56_v27 = vshrl.u32 %v310_v26, %v44_v13 }
  0x93   :  { %v59_v30 = vshrl.u32 %v311_v29, %v44_v13  ;;  %v45_v40 = vshrl.u32 %v306_v15, %v44_v13  ;;  %vm63_vm3 = vcmp.lt.s32.totalorder %v42_v14, 3  ;;  %vm62_vm4 = vcmp.lt.s32.totalorder %v42_v14, 2 }
  0x94   :  { %v48_v32 = vor.u32 %v47_v19, %v46_v16  ;;  %v51_v33 = vor.u32 %v50_v21, %v49_v18  ;;  %v54_v34 = vor.u32 %v53_v24, %v52_v22  ;;  %v57_v35 = vor.u32 %v56_v27, %v55_v25 }
  0x95   :  { %v60_v36 = vor.u32 %v59_v30, %v58_v28  ;;  %v13_v24 = vlaneseq }
  0x96   :  { %v66_v37 = vsel %vm64_vm2, %v54_v34, 2102212464  ;;  %v69_v38 = vsel %vm61_vm1, %v48_v32, %v51_v33  ;;  %v73_v39 = vsel %vm61_vm1, %v51_v33, %v54_v34  ;;  %v70_v41 = vsel %vm64_vm2, %v57_v35, 920167782 }
  0x97   :  { %v74_v42 = vsel %vm64_vm2, %v60_v36, 1326507024  ;;  %v71_v43 = vsel %vm63_vm3, %v54_v34, %v70_v41  ;;  %v65_v46 = vsel %vm61_vm1, %v45_v40, %v48_v32  ;;  %v67_v47 = vsel %vm63_vm3, %v51_v33, %v66_v37 }
  0x98   :  { %v75_v44 = vsel %vm63_vm3, %v57_v35, %v74_v42  ;;  %v72_v48 = vsel %vm62_vm4, %v69_v38, %v71_v43  ;;  %v68_v54 = vsel %vm62_vm4, %v65_v46, %v67_v47  ;;  %v14_v26 = vand.u32 127, %v13_v24 }
  0x99   :  { %v76_v49 = vsel %vm62_vm4, %v73_v39, %v75_v44  ;;  %v343_v52 = vmul.u32.u64.low %v77_v45, %v72_v48  ;;  %v344_v53 = vmul.u32.u64.high %v77_v45, %v72_v48, %v343_v52  ;;  %v84_v56 = vmul.u32 %v77_v45, %v68_v54 }
  0x9a   :  { %v340_v50 = vmul.u32.u64.low %v77_v45, %v76_v49  ;;  %v341_v51 = vmul.u32.u64.high %v77_v45, %v76_v49, %v340_v50  ;;  %vm15_vm9 = vcmp.lt.s32.totalorder %v14_v26, 16  ;;  %vm239_vm1 = vcmask 261120  }
  0x9b   :  { %v87_v55 = vadd.s32 1, %v344_v53 }
  0x9c   :  { %vm86_vm5 = vc.u32 %v341_v51, %v343_v52  ;;  %v85_v5 = vadd.s32 %v343_v52, %v341_v51 }
  0x9d   :  { %v88_v57 = vsel %vm86_vm5, %v87_v55, %v344_v53 }
  0x9e   :  { %v89_v58 = vadd.s32 %v88_v57, %v84_v56 }
  0xa0   :  { %v90_v59 = vadd.s32 536870912, %v89_v58 }
  0xa2   :  { %v91_v60 = vshrl.u32 %v90_v59, 30 }
  0xa4   :  { %v92_v61 = vshll.u32 %v91_v60, 30  ;;  %v115_v18 = vsub.s32 4, %v91_v60 }
  0xa6   :  { %v93_v62 = vsub.s32 %v89_v58, %v92_v61  ;;  %v116_v21 = vsel %vm31_vm7, %v115_v18, %v91_v60 }
  0xa7   :  { %v118_v23 = vsel %vm30_vm8, 0, %v116_v21 }
  0xa8   :  { %v95_v63 = vsub.s32 0, %v93_v62  ;;  %v122_v25 = vadd.s32 3, %v118_v23  ;;  %v226_v28 = vand.u32 3, %v118_v23 }
  0xaa   :  { %v257_v0 = vmin.u32 %v95_v63, %v93_v62  ;;  %v123_v27 = vand.u32 3, %v122_v25  ;;  %vm231_vm11 = vcmp.eq.s32.totalorder %v226_v28, 2  ;;  %vm228_vm13 = vcmp.eq.s32.totalorder %v226_v28, 0 }
  0xab   :  { %vm227_vm15 = vcmp.lt.s32.totalorder %v226_v28, 2 }
  0xac   :  { %v97_v1 = vclz %v257_v0  ;;  %vm128_vm10 = vcmp.eq.s32.totalorder %v123_v27, 2  ;;  %vm125_vm12 = vcmp.eq.s32.totalorder %v123_v27, 0  ;;  %vm124_vm14 = vcmp.lt.s32.totalorder %v123_v27, 2 }
  0xae   :  { %v258_v2 = vadd.s32 4294967294, %v97_v1 }
  0xb0   :  { %vm259_vm6 = vcmp.lt.s32.totalorder %v258_v2, 0 }
  0xb1   :  { %v100_v3 = vsel %vm259_vm6, 0, %v258_v2 }
  0xb2   :  { %v101_v6 = vsub.s32 32, %v100_v3  ;;  %v105_v7 = vsub.s32 4294967266, %v100_v3  ;;  %v102_v8 = vshll.u32 %v93_v62, %v100_v3 }
  0xb4   :  { %v103_v10 = vshrl.u32 %v85_v5, %v101_v6  ;;  %v106_v11 = vadd.s32 127, %v105_v7 }
  0xb6   :  { %v104_v12 = vor.u32 %v103_v10, %v102_v8  ;;  %v107_v13 = vshll.u32 %v106_v11, 23 }
  0xb8   :  { %v108_v14 = vor.u32 4788187, %v107_v13  ;;  %v111_v16 = vcvt.s32.f32 %v104_v12 }
  0xba   :  { %v109_v15 = vand.u32 2147483647, %v108_v14 }
  0xbc   :  { %v112_v17 = vmul.f32 %v111_v16, %v109_v15 }
  0xbe   :  { %v113_v19 = vxor.u32 2147483648, %v112_v17 }
  0xc0   :  { %v114_v20 = vsel %vm31_vm7, %v113_v19, %v112_v17 }
  0xc1   :  { %v117_v22 = vsel %vm30_vm8, %v334_v4, %v114_v20 }
  0xc2   :  { %277 = vcosq.f32 %v117_v22 }
  0xc3   :  { %279 = vsinq.f32 %v117_v22 }
  0xcc   :  { %v278_v29 = vpop.eup %277 }
  0xcd   :  { %v280_v30 = vpop.eup %279  ;;  %v129_v31 = vxor.u32 2147483648, %v278_v29 }
  0xce   :  { %v126_v32 = vxor.u32 2147483648, %v280_v30 }
  0xcf   :  { %v130_v9 = vsel %vm128_vm10, %v129_v31, %v280_v30  ;;  %v233_v33 = vsel %vm231_vm11, %v129_v31, %v280_v30 }
  0xd0   :  { %v127_v34 = vsel %vm125_vm12, %v278_v29, %v126_v32  ;;  %v230_v35 = vsel %vm228_vm13, %v278_v29, %v126_v32 }
  0xd1   :  { %v131_v36 = vsel %vm124_vm14, %v127_v34, %v130_v9  ;;  %v234_v37 = vsel %vm227_vm15, %v230_v35, %v233_v33 }
  0xd2   :  { %v132_v38 = vsel %vm121_vm0, nan, %v131_v36  ;;  %v235_v39 = vsel %vm121_vm0, nan, %v234_v37 }
  0xd3   :  { %v238_v40 = vsel %vm15_vm9, %v132_v38, %v235_v39 }
  0xd4   :  { %240 = vst.msk [vmem:[#allocation2] sm:$0xff] %vm239_vm1, %v238_v40 }
  0xd5   :  { %292 = shalt.err (!%p289_p4)
}
  0xd6   :  { %s293_s16 = scalar_lea.hbm %s370_s2, 128 }
  0xd7   :  { %p294_p5 = scmp.ne.s32.totalorder %s370_s2, %s293_s16  ;;  %p297_p6 = scmp.lt.u32.totalorder %s293_s16, %s370_s2 }
  0xd9   :  { %p299_p7 = pnand %p297_p6, %p294_p5 }
  0xdb   :  { %302 = shalt.err (!%p299_p7)
}
  0xdc   :  { %250 = dma.vmem_to_hbm [thread:$0]  %s248_s1, 128, %s370_s2, [#allocation3]  }
  0xdd   :  { %303 = dma.done.wait [#allocation3], 128  }
  0xde   :  { %304 = vsyncadd [#allocation3], 4294967168 }
  0xdf   :  { %254 = vsyncpa [#allocation3], 1 }

</bundles_post_ra>
